<compile_context>
chip_gen: v7x
topology: tpu7x:2x2x1
jax: 0.10.0
libtpu: 0.0.40
codegen_flags: <defaults>
</compile_context>

<pallas_src>
import numpy as np
import jax
import jax.numpy as jnp
from jax.experimental import pallas as pl
from jax.experimental.pallas import tpu as pltpu

# ----------------------------- model constants -----------------------------
NUM_BODY_JOINTS = 21                       # SMPLH body joints (excluding root)
NUM_HAND_JOINTS = 15                       # per hand
NUM_JOINTS = NUM_BODY_JOINTS + 2 * NUM_HAND_JOINTS   # 51 (SMPLH.NUM_JOINTS)
J = NUM_JOINTS + 1                         # 52 joints incl. root
JPAD = 128                                 # J padded to a full lane width
NUM_BETAS = 16
V = 128                                    # small synthetic vertex count (real SMPLH: 6890)
P = NUM_JOINTS * 9                         # 459 pose-blendshape basis size
KCOMB = 512                                # combined [betas | pose_feature | pad] K dim
assert NUM_BETAS + P <= KCOMB
N_FACES = 64
B_DEFAULT = 2

F32 = jnp.float32
BF16 = jnp.bfloat16

# Real SMPL-H kinematic tree (52 joints): body (22) + left hand (15) + right hand (15).
SMPLH_PARENTS = np.array(
    [-1, 0, 0, 0, 1, 2, 3, 4, 5, 6, 7, 8, 9, 9, 9, 12, 13, 14, 16, 17, 18, 19,
     20, 22, 23, 20, 25, 26, 20, 28, 29, 20, 31, 32, 20, 34, 35,
     21, 37, 38, 21, 40, 41, 21, 43, 44, 21, 46, 47, 21, 49, 50],
    dtype=np.int32)
assert SMPLH_PARENTS.shape[0] == J


class Struct:
    def __init__(self, **kwargs):
        self.__dict__.update(kwargs)


# ------------------------------ Pallas kernels ------------------------------
def _joint_kernel(betas_ref, sj_ref, jt_ref, jrest_ref):
    # betas_ref : (M, 16) bf16     sj_ref : (16, 3*JPAD) bf16
    # jt_ref    : (1, 3*JPAD) f32  jrest_ref : (M, 3*JPAD) f32  (lane-dense)
    jrest_ref[...] = jnp.dot(betas_ref[...], sj_ref[...],
                             preferred_element_type=jnp.float32) + jt_ref[...]


def _lbs_kernel(feat_ref, sdpd_ref, vt_ref, a_rows_ref, wT_ref, verts_ref):
    # feat_ref   : (M, 512) bf16      [betas | pose_feature | zeros]
    # sdpd_ref   : (512, 3V) bf16     [shapedirs; posedirs; zeros]
    # vt_ref     : (1, 3V) f32
    # a_rows_ref : (12*M, JPAD) bf16  flattened 3x4 transforms, row e*M + b
    # wT_ref     : (JPAD, V) bf16     lbs weights (transposed, zero-padded rows)
    # verts_ref  : (M, 3V) f32        lane-dense [x | y | z]
    M = feat_ref.shape[0]

    # Shape + pose blendshapes in ONE MXU call (no v_shaped HBM round trip).
    v_posed = jnp.dot(feat_ref[...], sdpd_ref[...],
                      preferred_element_type=jnp.float32) + vt_ref[...]      # (M, 3V)

    # Per-vertex skinning transforms for the whole M-chunk in one matmul:
    # Tt[e*M + b, v] = sum_j A[b, j, e] * W[v, j]
    Tt = jnp.dot(a_rows_ref[...], wT_ref[...],
                 preferred_element_type=jnp.float32)                         # (12M, V)

    px = v_posed[:, 0:V]
    py = v_posed[:, V:2 * V]
    pz = v_posed[:, 2 * V:3 * V]

    def row(r):                       # whole-(8,128)-aligned sublane slice
        return Tt[r * M:(r + 1) * M, :]

    # Flattened 3x4 rows: [R00 R01 R02 t0 | R10 R11 R12 t1 | R20 R21 R22 t2]
    # (translation already includes the global transl, folded in the wrapper).
    verts_ref[:, 0:V]         = row(0) * px + row(1) * py + row(2) * pz + row(3)
    verts_ref[:, V:2 * V]     = row(4) * px + row(5) * py + row(6) * pz + row(7)
    verts_ref[:, 2 * V:3 * V] = row(8) * px + row(9) * py + row(10) * pz + row(11)


def _pad_plan(B):
    """Pad the frame/batch count to >= a vreg sublane multiple and pick M-chunks."""
    Bp = -(-B // 8) * 8
    if Bp > 128:
        Bp = -(-Bp // 128) * 128
        chunk = 128
    else:
        chunk = Bp
    return Bp, chunk, Bp // chunk


def _joint_pallas(betas_pad_bf, params, chunk, grid):
    Bp = betas_pad_bf.shape[0]
    return pl.pallas_call(
        _joint_kernel,
        out_shape=jax.ShapeDtypeStruct((Bp, 3 * JPAD), F32),
        grid=(grid,),
        in_specs=[
            pl.BlockSpec((chunk, NUM_BETAS), lambda i: (i, 0)),
            pl.BlockSpec((NUM_BETAS, 3 * JPAD), lambda i: (0, 0)),
            pl.BlockSpec((1, 3 * JPAD), lambda i: (0, 0)),
        ],
        out_specs=pl.BlockSpec((chunk, 3 * JPAD), lambda i: (i, 0)),
        compiler_params=pltpu.CompilerParams(
            dimension_semantics=("parallel",),
            vmem_limit_bytes=32 * 1024 * 1024),
    )(betas_pad_bf, params["SJ"], params["Jt"])


def _lbs_pallas(feat_bf, A_rows_bf, params, chunk, grid):
    Bp = feat_bf.shape[0]
    flops = 2 * Bp * KCOMB * 3 * V + 2 * 12 * Bp * JPAD * V + 9 * Bp * 3 * V
    bytes_accessed = (feat_bf.size * 2 + params["SDPD"].size * 2
                      + params["v_template_flat"].size * 4
                      + A_rows_bf.size * 2 + params["lbs_weights_T"].size * 2
                      + Bp * 3 * V * 4)
    return pl.pallas_call(
        _lbs_kernel,
        out_shape=jax.ShapeDtypeStruct((Bp, 3 * V), F32),
        grid=(grid,),
        in_specs=[
            pl.BlockSpec((chunk, KCOMB), lambda i: (i, 0)),
            pl.BlockSpec((KCOMB, 3 * V), lambda i: (0, 0)),
            pl.BlockSpec((1, 3 * V), lambda i: (0, 0)),
            pl.BlockSpec((12 * chunk, JPAD), lambda i: (i, 0)),
            pl.BlockSpec((JPAD, V), lambda i: (0, 0)),
        ],
        out_specs=pl.BlockSpec((chunk, 3 * V), lambda i: (i, 0)),
        compiler_params=pltpu.CompilerParams(
            dimension_semantics=("parallel",),
            vmem_limit_bytes=32 * 1024 * 1024),
        cost_estimate=pl.CostEstimate(flops=int(flops), transcendentals=0,
                                      bytes_accessed=int(bytes_accessed)),
    )(feat_bf, params["SDPD"], params["v_template_flat"], A_rows_bf,
      params["lbs_weights_T"])


# ------------------------------ plain-JAX glue ------------------------------
def batch_rodrigues(rot_vecs, eps=1e-8):
    """Axis-angle (N, 3) -> rotation matrices (N, 3, 3). Matches smplx.lbs."""
    angle = jnp.linalg.norm(rot_vecs + eps, axis=1, keepdims=True)          # (N, 1)
    rot_dir = rot_vecs / angle
    cos = jnp.cos(angle)[:, None, :]
    sin = jnp.sin(angle)[:, None, :]
    rx, ry, rz = rot_dir[:, 0], rot_dir[:, 1], rot_dir[:, 2]
    zeros = jnp.zeros_like(rx)
    K = jnp.stack([zeros, -rz, ry, rz, zeros, -rx, -ry, rx, zeros],
                  axis=1).reshape(-1, 3, 3)
    ident = jnp.eye(3, dtype=rot_vecs.dtype)[None]
    return ident + sin * K + (1.0 - cos) * jnp.matmul(K, K)


def _tree_levels(parents_np):
    depth = np.zeros(len(parents_np), dtype=np.int64)
    for j in range(1, len(parents_np)):
        depth[j] = depth[parents_np[j]] + 1
    return [[int(i) for i in np.nonzero(depth == d)[0]]
            for d in range(int(depth.max()) + 1)]


def batch_rigid_transform(rot_mats, joints, parents_np, levels):
    """rot_mats (B,J,3,3), rest joints (B,J,3) ->
       (posed_joints (B,J,3), world rotation R (B,J,3,3), rel translation A_t (B,J,3)).

    Kinematic chain is composed LEVEL-BY-LEVEL over the (static) tree depth:
    ~11 batched einsums instead of 51 serialized (B,4,4) matmuls.
    """
    # TODO(synk): a fully-fused Pallas chain kernel (parents in SMEM via scalar
    # prefetch + fori_loop over joints) would remove the remaining small XLA ops.
    par = np.asarray(parents_np)
    rel_joints = joints.at[:, 1:].set(joints[:, 1:] - joints[:, par[1:]])

    Jn = joints.shape[1]
    world_R = [None] * Jn
    world_t = [None] * Jn
    world_R[0] = rot_mats[:, 0]
    world_t[0] = joints[:, 0]
    for level in levels[1:]:
        p_idx = [int(par[j]) for j in level]
        Rp = jnp.stack([world_R[p] for p in p_idx], axis=1)                 # (B,n,3,3)
        tp = jnp.stack([world_t[p] for p in p_idx], axis=1)                 # (B,n,3)
        Rl = rot_mats[:, level]                                             # (B,n,3,3)
        tl = rel_joints[:, level]                                           # (B,n,3)
        Rw = jnp.einsum('bnij,bnjk->bnik', Rp, Rl)
        tw = jnp.einsum('bnij,bnj->bni', Rp, tl) + tp
        for k, jj in enumerate(level):
            world_R[jj] = Rw[:, k]
            world_t[jj] = tw[:, k]

    R = jnp.stack(world_R, axis=1)                                          # (B,J,3,3)
    t = jnp.stack(world_t, axis=1)                                          # (B,J,3)
    A_t = t - jnp.einsum('bjik,bjk->bji', R, joints)                        # rel transl
    return t, R, A_t


def make_params(key):
    ks = jax.random.split(key, 6)
    # Coordinate-major flat layout: column index = c*V + v  ->  [x_0..x_V | y | z].
    v_template_flat = 0.1 * jax.random.normal(ks[0], (1, 3 * V), dtype=F32)
    shapedirs_cm = 0.01 * jax.random.normal(ks[1], (NUM_BETAS, 3 * V), dtype=F32)
    posedirs_cm = 0.01 * jax.random.normal(ks[2], (P, 3 * V), dtype=F32)

    jreg = jnp.abs(jax.random.normal(ks[3], (J, V), dtype=F32))
    jreg = jreg / jnp.sum(jreg, axis=1, keepdims=True)                      # rows sum to 1

    lbs_w = jax.nn.softmax(jax.random.normal(ks[4], (V, J), dtype=F32), axis=-1)

    # --- kernel-ready packed operands (all MXU operands bf16) ---------------
    # Combined blendshape basis: K = [betas(16) | pose_feature(459) | zeros].
    SDPD = jnp.zeros((KCOMB, 3 * V), dtype=F32)
    SDPD = SDPD.at[:NUM_BETAS].set(shapedirs_cm)
    SDPD = SDPD.at[NUM_BETAS:NUM_BETAS + P].set(posedirs_cm)
    SDPD = SDPD.astype(BF16)

    # Joint regressor pre-composed with the shape basis: J_rest = Jt + betas @ SJ.
    sd3 = shapedirs_cm.reshape(NUM_BETAS, 3, V)
    SJ3 = jnp.einsum('kcv,jv->kcj', sd3, jreg)                              # (16,3,J)
    SJ = jnp.zeros((NUM_BETAS, 3, JPAD), dtype=F32).at[:, :, :J].set(SJ3)
    SJ = SJ.reshape(NUM_BETAS, 3 * JPAD).astype(BF16)                       # (16, 384)
    vt3 = v_template_flat.reshape(3, V)
    Jt3 = jnp.einsum('cv,jv->cj', vt3, jreg)                                # (3, J)
    Jt = jnp.zeros((3, JPAD), dtype=F32).at[:, :J].set(Jt3).reshape(1, 3 * JPAD)

    lbs_wT = jnp.zeros((JPAD, V), dtype=F32).at[:J, :].set(lbs_w.T).astype(BF16)

    parents = SMPLH_PARENTS.copy()
    levels = _tree_levels(parents)
    faces = (jnp.arange(N_FACES * 3, dtype=jnp.int32).reshape(N_FACES, 3)) % V
    return {
        "v_template_flat": v_template_flat,   # (1, 3V) f32
        "SDPD": SDPD,                         # (512, 3V) bf16
        "SJ": SJ,                             # (16, 3*JPAD) bf16
        "Jt": Jt,                             # (1, 3*JPAD) f32
        "lbs_weights_T": lbs_wT,              # (JPAD, V) bf16, zero-padded rows
        "parents": parents,
        "levels": levels,
        "faces": faces,
    }


def body_model_forward(params, root_orient=None, pose_body=None, pose_hand=None,
                       betas=None, trans=None, return_dict=False):
    """Mirrors BodyModel.forward (SMPLH, flat_hand_mean=True, no dmpls)."""
    B = pose_body.shape[0]
    if pose_hand is None:
        pose_hand = jnp.zeros((B, 2 * NUM_HAND_JOINTS * 3), dtype=F32)
    if betas.ndim == 1:
        betas = jnp.broadcast_to(betas[None, :], (B, betas.shape[0]))
    if trans is None:
        trans = jnp.zeros((B, 3), dtype=F32)

    Bp, chunk, grid = _pad_plan(B)          # batch padded to a sublane multiple

    full_pose = jnp.concatenate([root_orient, pose_body, pose_hand], axis=1)   # (B, 156)
    rot_mats = batch_rodrigues(full_pose.reshape(-1, 3)).reshape(B, J, 3, 3)
    pose_feature = (rot_mats[:, 1:] - jnp.eye(3, dtype=F32)).reshape(B, P)     # (B, 459)

    # --- Pallas kernel 1: rest-joint regression (single merged matmul) ---
    betas_pad = jnp.zeros((Bp, NUM_BETAS), F32).at[:B].set(betas).astype(BF16)
    jrest_flat = _joint_pallas(betas_pad, params, chunk, grid)                 # (Bp, 384)
    j_rest = jrest_flat[:B].reshape(B, 3, JPAD).transpose(0, 2, 1)[:, :J, :]   # (B, J, 3)

    # --- level-batched kinematic chain (JAX) ---
    posed_joints, A_R, A_t = batch_rigid_transform(
        rot_mats, j_rest, params["parents"], params["levels"])

    # Fold global translation into the 3x4 skinning transforms, group rows per
    # M-chunk so every in-kernel row(r) slice is a whole (8,128)-aligned block.
    A34 = jnp.concatenate([A_R, (A_t + trans[:, None, :])[..., None]], axis=-1)  # (B,J,3,4)
    A12 = A34.reshape(B, J, 12)
    A12p = jnp.zeros((Bp, JPAD, 12), F32).at[:B, :J, :].set(A12)
    A_rows = (A12p.reshape(grid, chunk, JPAD, 12)
                   .transpose(0, 3, 1, 2)
                   .reshape(grid * 12 * chunk, JPAD)
                   .astype(BF16))

    feat = (jnp.zeros((Bp, KCOMB), F32)
              .at[:B, :NUM_BETAS].set(betas)
              .at[:B, NUM_BETAS:NUM_BETAS + P].set(pose_feature)
              .astype(BF16))

    # --- Pallas kernel 2: blendshapes + LBS skinning (one pass, lane-dense) ---
    verts_flat = _lbs_pallas(feat, A_rows, params, chunk, grid)                # (Bp, 3V)
    # NOTE: keep the lane-dense (B,3V) slab if the consumer allows; the (B,V,3)
    # transpose below is only for API parity with the PyTorch module.
    verts = verts_flat[:B].reshape(B, 3, V).transpose(0, 2, 1)                 # (B, V, 3)

    # TODO(synk): vertex_joint_selector extras (hand-tip vertices) are not
    # appended; BodyModel slices Jtr[:, :num_joints+1] so they are dropped anyway.
    Jtr = (posed_joints + trans[:, None, :])[:, : NUM_JOINTS + 1]              # (B, 52, 3)

    out = {"v": verts, "f": params["faces"], "Jtr": Jtr}
    if not return_dict:
        out = Struct(**out)
    return out


def body_model_forward_motion(params, **kwargs):
    # Frame folding: all Bm*W frames go straight into the MXU M dimension.
    Bm, W, _ = kwargs["pose_body"].shape
    flat = {k: v.reshape(Bm * W, v.shape[-1]) for k, v in kwargs.items()}
    out = body_model_forward(params, **flat)
    out.v = out.v.reshape(Bm, W, -1, 3)
    out.Jtr = out.Jtr.reshape(Bm, W, -1, 3)
    return out


# ----------------------------------- main -----------------------------------
if __name__ == "__main__":
    key = jax.random.PRNGKey(0)
    k_par, k_ro, k_pb, k_be, k_tr = jax.random.split(key, 5)

    params = make_params(k_par)

    B = B_DEFAULT
    root_orient = 0.1 * jax.random.normal(k_ro, (B, 3), dtype=F32)
    pose_body = 0.1 * jax.random.normal(k_pb, (B, NUM_BODY_JOINTS * 3), dtype=F32)
    betas = 0.5 * jax.random.normal(k_be, (NUM_BETAS,), dtype=F32)      # 1-D path
    trans = 0.1 * jax.random.normal(k_tr, (B, 3), dtype=F32)

    @jax.jit
    def fwd(ro, pb, be, tr):
        return body_model_forward(params, root_orient=ro, pose_body=pb,
                                  pose_hand=None, betas=be, trans=tr,
                                  return_dict=True)

    out_d = fwd(root_orient, pose_body, betas, trans)
    out = Struct(**out_d)
    jax.block_until_ready(out.v)
    jax.block_until_ready(out.Jtr)

    assert out.v.shape == (B, V, 3)
    assert out.Jtr.shape == (B, NUM_JOINTS + 1, 3)
    assert bool(jnp.all(jnp.isfinite(out.v))) and bool(jnp.all(jnp.isfinite(out.Jtr)))

    # forward_motion path: Bm*W = 16 frames folded into the MXU M dimension.
    Bm, W = 2, 8
    km = jax.random.split(jax.random.PRNGKey(1), 3)
    ro_m = 0.1 * jax.random.normal(km[0], (Bm, W, 3), dtype=F32)
    pb_m = 0.1 * jax.random.normal(km[1], (Bm, W, NUM_BODY_JOINTS * 3), dtype=F32)
    tr_m = 0.1 * jax.random.normal(km[2], (Bm, W, 3), dtype=F32)
    be_m = jnp.broadcast_to(betas, (Bm, W, NUM_BETAS))

    @jax.jit
    def fwd_motion(ro, pb, be, tr):
        o = body_model_forward_motion(params, root_orient=ro, pose_body=pb,
                                      betas=be, trans=tr)
        return o.v, o.Jtr

    v_m, jtr_m = fwd_motion(ro_m, pb_m, be_m, tr_m)
    jax.block_until_ready(v_m)
    assert v_m.shape == (Bm, W, V, 3)
    assert jtr_m.shape == (Bm, W, NUM_JOINTS + 1, 3)
    assert bool(jnp.all(jnp.isfinite(v_m)))

    print("KERNEL_OK")
</pallas_src>

<mosaic_0001>
module attributes {stable_mosaic.version = 11 : i64} {
  func.func @_joint_kernel(%arg0: i32, %arg1: memref<8x16xbf16, #tpu.memory_space<vmem>>, %arg2: memref<16x384xbf16, #tpu.memory_space<vmem>>, %arg3: memref<1x384xf32, #tpu.memory_space<vmem>>, %arg4: memref<8x384xf32, #tpu.memory_space<vmem>>) attributes {dimension_semantics = [#tpu.dimension_semantics<parallel>], iteration_bounds = array<i64: 1>, scalar_prefetch = 0 : i64, scratch_operands = 0 : i64, tpu.core_type = #tpu.core_type<tc>, window_params = [{transform_indices = @transform_0, window_bounds = array<i64: 8, 16>}, {pipeline_mode = #tpu.pipeline_mode<synchronous>, transform_indices = @transform_1, window_bounds = array<i64: 16, 384>}, {pipeline_mode = #tpu.pipeline_mode<synchronous>, transform_indices = @transform_2, window_bounds = array<i64: 1, 384>}, {transform_indices = @transform_3, window_bounds = array<i64: 8, 384>}]} {
    %c0 = arith.constant 0 : index
    %c0_0 = arith.constant 0 : index
    %0 = vector.load %arg1[%c0, %c0_0] : memref<8x16xbf16, #tpu.memory_space<vmem>>, vector<8x16xbf16>
    %c0_1 = arith.constant 0 : index
    %c0_2 = arith.constant 0 : index
    %1 = vector.load %arg2[%c0_1, %c0_2] : memref<16x384xbf16, #tpu.memory_space<vmem>>, vector<16x384xbf16>
    %cst = arith.constant dense<0.000000e+00> : vector<8x384xf32>
    %2 = tpu.matmul %0, %1, %cst {dimension_numbers = #tpu.dot_dimension_numbers<[1], [0], [0], [1], [0, 0, 1, 1], [], []>} : vector<8x16xbf16>, vector<16x384xbf16>, vector<8x384xf32> -> vector<8x384xf32>
    %c0_3 = arith.constant 0 : index
    %c0_4 = arith.constant 0 : index
    %3 = vector.load %arg3[%c0_3, %c0_4] : memref<1x384xf32, #tpu.memory_space<vmem>>, vector<1x384xf32>
    %4 = vector.broadcast %3 : vector<1x384xf32> to vector<8x384xf32>
    %5 = arith.addf %2, %4 : vector<8x384xf32>
    %c0_5 = arith.constant 0 : index
    %c0_6 = arith.constant 0 : index
    %6 = vector.load %arg4[%c0_5, %c0_6] : memref<8x384xf32, #tpu.memory_space<vmem>>, vector<8x384xf32>
    tpu.vector_store %arg4[%c0_5, %c0_6], %5 {strides = array<i32>} : memref<8x384xf32, #tpu.memory_space<vmem>>, vector<8x384xf32>,
    return
  }
  func.func @transform_0(%arg0: i32) -> (i32, i32) {
    %c0_i32 = arith.constant 0 : i32
    %c0_i32_0 = arith.constant 0 : i32
    return %arg0, %c0_i32 : i32, i32
  }
  func.func @transform_1(%arg0: i32) -> (i32, i32) {
    %c0_i32 = arith.constant 0 : i32
    %c0_i32_0 = arith.constant 0 : i32
    %c0_i32_1 = arith.constant 0 : i32
    return %c0_i32, %c0_i32_0 : i32, i32
  }
  func.func @transform_2(%arg0: i32) -> (i32, i32) {
    %c0_i32 = arith.constant 0 : i32
    %c0_i32_0 = arith.constant 0 : i32
    %c0_i32_1 = arith.constant 0 : i32
    return %c0_i32, %c0_i32_0 : i32, i32
  }
  func.func @transform_3(%arg0: i32) -> (i32, i32) {
    %c0_i32 = arith.constant 0 : i32
    %c0_i32_0 = arith.constant 0 : i32
    return %arg0, %c0_i32 : i32, i32
  }
}

module attributes {stable_mosaic.version = 11 : i64} {
  func.func @_lbs_kernel(%arg0: i32, %arg1: memref<8x512xbf16, #tpu.memory_space<vmem>>, %arg2: memref<512x384xbf16, #tpu.memory_space<vmem>>, %arg3: memref<1x384xf32, #tpu.memory_space<vmem>>, %arg4: memref<96x128xbf16, #tpu.memory_space<vmem>>, %arg5: memref<128x128xbf16, #tpu.memory_space<vmem>>, %arg6: memref<8x384xf32, #tpu.memory_space<vmem>>) attributes {dimension_semantics = [#tpu.dimension_semantics<parallel>], iteration_bounds = array<i64: 1>, scalar_prefetch = 0 : i64, scratch_operands = 0 : i64, tpu.core_type = #tpu.core_type<tc>, window_params = [{transform_indices = @transform_0, window_bounds = array<i64: 8, 512>}, {pipeline_mode = #tpu.pipeline_mode<synchronous>, transform_indices = @transform_1, window_bounds = array<i64: 512, 384>}, {pipeline_mode = #tpu.pipeline_mode<synchronous>, transform_indices = @transform_2, window_bounds = array<i64: 1, 384>}, {transform_indices = @transform_3, window_bounds = array<i64: 96, 128>}, {pipeline_mode = #tpu.pipeline_mode<synchronous>, transform_indices = @transform_4, window_bounds = array<i64: 128, 128>}, {transform_indices = @transform_5, window_bounds = array<i64: 8, 384>}]} {
    %c0 = arith.constant 0 : index
    %c0_0 = arith.constant 0 : index
    %0 = vector.load %arg1[%c0, %c0_0] : memref<8x512xbf16, #tpu.memory_space<vmem>>, vector<8x512xbf16>
    %c0_1 = arith.constant 0 : index
    %c0_2 = arith.constant 0 : index
    %1 = vector.load %arg2[%c0_1, %c0_2] : memref<512x384xbf16, #tpu.memory_space<vmem>>, vector<512x384xbf16>
    %cst = arith.constant dense<0.000000e+00> : vector<8x384xf32>
    %2 = tpu.matmul %0, %1, %cst {dimension_numbers = #tpu.dot_dimension_numbers<[1], [0], [0], [1], [0, 0, 1, 1], [], []>} : vector<8x512xbf16>, vector<512x384xbf16>, vector<8x384xf32> -> vector<8x384xf32>
    %c0_3 = arith.constant 0 : index
    %c0_4 = arith.constant 0 : index
    %3 = vector.load %arg3[%c0_3, %c0_4] : memref<1x384xf32, #tpu.memory_space<vmem>>, vector<1x384xf32>
    %4 = vector.broadcast %3 : vector<1x384xf32> to vector<8x384xf32>
    %5 = arith.addf %2, %4 : vector<8x384xf32>
    %c0_5 = arith.constant 0 : index
    %c0_6 = arith.constant 0 : index
    %6 = vector.load %arg4[%c0_5, %c0_6] : memref<96x128xbf16, #tpu.memory_space<vmem>>, vector<96x128xbf16>
    %c0_7 = arith.constant 0 : index
    %c0_8 = arith.constant 0 : index
    %7 = vector.load %arg5[%c0_7, %c0_8] : memref<128x128xbf16, #tpu.memory_space<vmem>>, vector<128x128xbf16>
    %cst_9 = arith.constant dense<0.000000e+00> : vector<96x128xf32>
    %8 = tpu.matmul %6, %7, %cst_9 {dimension_numbers = #tpu.dot_dimension_numbers<[1], [0], [0], [1], [0, 0, 1, 1], [], []>} : vector<96x128xbf16>, vector<128x128xbf16>, vector<96x128xf32> -> vector<96x128xf32>
    %9 = vector.extract_strided_slice %5 {offsets = [0, 0], sizes = [8, 128], strides = [1, 1]} : vector<8x384xf32> to vector<8x128xf32>
    %10 = vector.extract_strided_slice %5 {offsets = [0, 128], sizes = [8, 128], strides = [1, 1]} : vector<8x384xf32> to vector<8x128xf32>
    %11 = vector.extract_strided_slice %5 {offsets = [0, 256], sizes = [8, 128], strides = [1, 1]} : vector<8x384xf32> to vector<8x128xf32>
    %12 = vector.extract_strided_slice %8 {offsets = [0, 0], sizes = [8, 128], strides = [1, 1]} : vector<96x128xf32> to vector<8x128xf32>
    %13 = arith.mulf %12, %9 : vector<8x128xf32>
    %14 = vector.extract_strided_slice %8 {offsets = [8, 0], sizes = [8, 128], strides = [1, 1]} : vector<96x128xf32> to vector<8x128xf32>
    %15 = arith.mulf %14, %10 : vector<8x128xf32>
    %16 = arith.addf %13, %15 : vector<8x128xf32>
    %17 = vector.extract_strided_slice %8 {offsets = [16, 0], sizes = [8, 128], strides = [1, 1]} : vector<96x128xf32> to vector<8x128xf32>
    %18 = arith.mulf %17, %11 : vector<8x128xf32>
    %19 = arith.addf %16, %18 : vector<8x128xf32>
    %20 = vector.extract_strided_slice %8 {offsets = [24, 0], sizes = [8, 128], strides = [1, 1]} : vector<96x128xf32> to vector<8x128xf32>
    %21 = arith.addf %19, %20 : vector<8x128xf32>
    %c0_10 = arith.constant 0 : index
    %c0_11 = arith.constant 0 : index
    %22 = vector.load %arg6[%c0_10, %c0_11] : memref<8x384xf32, #tpu.memory_space<vmem>>, vector<8x128xf32>
    tpu.vector_store %arg6[%c0_10, %c0_11], %21 {strides = array<i32>} : memref<8x384xf32, #tpu.memory_space<vmem>>, vector<8x128xf32>,
    %23 = vector.extract_strided_slice %8 {offsets = [32, 0], sizes = [8, 128], strides = [1, 1]} : vector<96x128xf32> to vector<8x128xf32>
    %24 = arith.mulf %23, %9 : vector<8x128xf32>
    %25 = vector.extract_strided_slice %8 {offsets = [40, 0], sizes = [8, 128], strides = [1, 1]} : vector<96x128xf32> to vector<8x128xf32>
    %26 = arith.mulf %25, %10 : vector<8x128xf32>
    %27 = arith.addf %24, %26 : vector<8x128xf32>
    %28 = vector.extract_strided_slice %8 {offsets = [48, 0], sizes = [8, 128], strides = [1, 1]} : vector<96x128xf32> to vector<8x128xf32>
    %29 = arith.mulf %28, %11 : vector<8x128xf32>
    %30 = arith.addf %27, %29 : vector<8x128xf32>
    %31 = vector.extract_strided_slice %8 {offsets = [56, 0], sizes = [8, 128], strides = [1, 1]} : vector<96x128xf32> to vector<8x128xf32>
    %32 = arith.addf %30, %31 : vector<8x128xf32>
    %c0_12 = arith.constant 0 : index
    %c128 = arith.constant 128 : index
    %33 = vector.load %arg6[%c0_12, %c128] : memref<8x384xf32, #tpu.memory_space<vmem>>, vector<8x128xf32>
    tpu.vector_store %arg6[%c0_12, %c128], %32 {strides = array<i32>} : memref<8x384xf32, #tpu.memory_space<vmem>>, vector<8x128xf32>,
    %34 = vector.extract_strided_slice %8 {offsets = [64, 0], sizes = [8, 128], strides = [1, 1]} : vector<96x128xf32> to vector<8x128xf32>
    %35 = arith.mulf %34, %9 : vector<8x128xf32>
    %36 = vector.extract_strided_slice %8 {offsets = [72, 0], sizes = [8, 128], strides = [1, 1]} : vector<96x128xf32> to vector<8x128xf32>
    %37 = arith.mulf %36, %10 : vector<8x128xf32>
    %38 = arith.addf %35, %37 : vector<8x128xf32>
    %39 = vector.extract_strided_slice %8 {offsets = [80, 0], sizes = [8, 128], strides = [1, 1]} : vector<96x128xf32> to vector<8x128xf32>
    %40 = arith.mulf %39, %11 : vector<8x128xf32>
    %41 = arith.addf %38, %40 : vector<8x128xf32>
    %42 = vector.extract_strided_slice %8 {offsets = [88, 0], sizes = [8, 128], strides = [1, 1]} : vector<96x128xf32> to vector<8x128xf32>
    %43 = arith.addf %41, %42 : vector<8x128xf32>
    %c0_13 = arith.constant 0 : index
    %c256 = arith.constant 256 : index
    %44 = vector.load %arg6[%c0_13, %c256] : memref<8x384xf32, #tpu.memory_space<vmem>>, vector<8x128xf32>
    tpu.vector_store %arg6[%c0_13, %c256], %43 {strides = array<i32>} : memref<8x384xf32, #tpu.memory_space<vmem>>, vector<8x128xf32>,
    return
  }
  func.func @transform_0(%arg0: i32) -> (i32, i32) {
    %c0_i32 = arith.constant 0 : i32
    %c0_i32_0 = arith.constant 0 : i32
    return %arg0, %c0_i32 : i32, i32
  }
  func.func @transform_1(%arg0: i32) -> (i32, i32) {
    %c0_i32 = arith.constant 0 : i32
    %c0_i32_0 = arith.constant 0 : i32
    %c0_i32_1 = arith.constant 0 : i32
    return %c0_i32, %c0_i32_0 : i32, i32
  }
  func.func @transform_2(%arg0: i32) -> (i32, i32) {
    %c0_i32 = arith.constant 0 : i32
    %c0_i32_0 = arith.constant 0 : i32
    %c0_i32_1 = arith.constant 0 : i32
    return %c0_i32, %c0_i32_0 : i32, i32
  }
  func.func @transform_3(%arg0: i32) -> (i32, i32) {
    %c0_i32 = arith.constant 0 : i32
    %c0_i32_0 = arith.constant 0 : i32
    return %arg0, %c0_i32 : i32, i32
  }
  func.func @transform_4(%arg0: i32) -> (i32, i32) {
    %c0_i32 = arith.constant 0 : i32
    %c0_i32_0 = arith.constant 0 : i32
    %c0_i32_1 = arith.constant 0 : i32
    return %c0_i32, %c0_i32_0 : i32, i32
  }
  func.func @transform_5(%arg0: i32) -> (i32, i32) {
    %c0_i32 = arith.constant 0 : i32
    %c0_i32_0 = arith.constant 0 : i32
    return %arg0, %c0_i32 : i32, i32
  }
}

</mosaic_0001>

<bundles_post_ra>
// kernel: fwd.2
= control target key start
LH: loop header
LB: loop body
LE: loop exit
PB: predicated region body
PF: predicated region fallthrough
CT: control target
= control target key end

     0   :  { %v165_v0 = vmov 0.0   ;;  %vm166_vm0 = vmmov 0   ;;  %v167_v3 = vmov 0   ;;  %vm53_vm1 = vcmask 130048   ;;  %s212_s1 = inlined_call_operand.vmem [shape: bf16[16,384], index: 1, kind: input, shape index: {}]   ;;  %s213_s0 = inlined_call_operand.vmem [shape: bf16[8,16], index: 0, kind: input, shape index: {}]   ;;  %s214_s2 = inlined_call_operand.vmem [shape: f32[1,384], index: 2, kind: input, shape index: {}]   ;;  %s215_s3 = inlined_call_operand.vmem [shape: f32[8,384], index: 3, kind: output, shape index: {}]  }
   0x1   :  { %152 = vmatprep.subr.bf16.mxu1 %v165_v0  ;;  %v161_v1 = vld [vmem:[%s212_s1 + $0x4] ss:$12 sps:$4 sm:$0xff]   ;;  %154 = vmatprep.mubr.msk.bf16.mxu1 %vm166_vm0, %v165_v0  ;;  %v163_v2 = vld [vmem:[%s212_s1 + $0x8] ss:$12 sps:$4 sm:$0xff]   ;;  %v164_v4 = vld [vmem:[%s212_s1] ss:$12 sps:$4 sm:$0xff]   ;;  %v22_v6 = vlaneseq }
   0x2   :  { %89 = vmatprep.mubr.bf16.mxu0 %v167_v3  ;;  %57 = vmatprep.subr.bf16.mxu0 %v161_v1  ;;  %v15_v5 = vld [vmem:[%s213_s0] sm:$0xf] }
   0x3   :  { %153 = vmatpush3.bf16.msra.mxu1 %v163_v2  ;;  %58 = vmatpush1.bf16.msra.mxu0 %v164_v4  ;;  %v23_v7 = vshrl.u32 %v22_v6, 7  ;;  %v20_v9 = vld [vmem:[%s214_s2] sm:$0x7] }
   0x5   :  { %v32_v8 = vsub.s32 2, %v23_v7  ;;  %v24_v10 = vsub.s32 0, %v23_v7  ;;  %v28_v11 = vsub.s32 1, %v23_v7 }
   0x6   :  { %155 = vmatmul.mubr.msk.bf16.vlgmr.msra.gmra.mrb[0].mxu1 %vm53_vm1, %v15_v5  ;;  %148 = vmatmul.mubr.msk.bf16.vlgmr.msra.gmra.mrb[0].mxu0 %vm53_vm1, %v15_v5 }
   0x7   :  { %v33_v12 = vrot.slane %v20_v9, %v32_v8  ;;  %v25_v13 = vrot.slane %v20_v9, %v24_v10  ;;  %v29_v14 = vrot.slane %v20_v9, %v28_v11 }
  0xd9   :  { %v132_v15 = vpop.f32.mrb[0].mxu1  ;;  %v91_v17 = vpop.f32.mrb[0].mxu0 }
  0xda   :  { %v133_v16 = vadd.f32 %v132_v15, %v33_v12  ;;  %v156_v18 = vpop.f32.mrb[1].mxu1  ;;  %v92_v19 = vadd.f32 %v91_v17, %v25_v13  ;;  %v93_v20 = vpop.f32.mrb[1].mxu0 }
  0xdb   :  { %v135_v21 = vpop.f32.mrb[2].mxu1  ;;  %v94_v22 = vadd.f32 %v93_v20, %v29_v14  ;;  %v95_v23 = vpop.f32.mrb[2].mxu0 }
  0xdc   :  { %140 = vst [vmem:[%s215_s3 + $0x10] sm:$0xff] %v133_v16  ;;  %v157_v24 = vpop.f32.mrb[3].mxu1  ;;  %138 = vst [vmem:[%s215_s3] sm:$0xff] %v92_v19  ;;  %v96_v25 = vpop.f32.mrb[3].mxu0 }
  0xdd   :  { %139 = vst [vmem:[%s215_s3 + $0x8] sm:$0xff] %v94_v22 }

// kernel: fwd.3
= control target key start
LH: loop header
LB: loop body
LE: loop exit
PB: predicated region body
PF: predicated region fallthrough
CT: control target
= control target key end

     0   :  { %s1822_s1 = inlined_call_operand.vmem [shape: bf16[512,384], index: 1, kind: input, shape index: {}]   ;;  %s1823_s0 = inlined_call_operand.vmem [shape: bf16[8,512], index: 0, kind: input, shape index: {}]   ;;  %s1824_s4 = inlined_call_operand.vmem [shape: bf16[128,128], index: 4, kind: input, shape index: {}]   ;;  %s1825_s3 = inlined_call_operand.vmem [shape: bf16[96,128], index: 3, kind: input, shape index: {}]   ;;  %s1826_s2 = inlined_call_operand.vmem [shape: f32[1,384], index: 2, kind: input, shape index: {}]   ;;  %s1827_s5 = inlined_call_operand.vmem [shape: f32[8,384], index: 5, kind: output, shape index: {}]  }
   0x1   :  { %v1280_v0 = vld [vmem:[%s1822_s1 + $0x4] ss:$12 sps:$4 sm:$0xff]   ;;  %v1282_v1 = vld [vmem:[%s1822_s1 + $0xc8] ss:$12 sps:$4 sm:$0xff]   ;;  %v1283_v2 = vld [vmem:[%s1822_s1] ss:$12 sps:$4 sm:$0xff]  }
   0x2   :  { %694 = vmatprep.subr.bf16.mxu0 %v1280_v0  ;;  %1188 = vmatprep.subr.bf16.mxu1 %v1282_v1  ;;  %v1284_v3 = vld [vmem:[%s1822_s1 + $0x8] ss:$12 sps:$4 sm:$0xff]   ;;  %v1287_v5 = vld [vmem:[%s1822_s1 + $0xe0] ss:$12 sps:$4 sm:$0xff]   ;;  %v1288_v6 = vld [vmem:[%s1822_s1 + $0x18] ss:$12 sps:$4 sm:$0xff]  }
   0x3   :  { %695 = vmatpush1.bf16.msra.mxu0 %v1283_v2  ;;  %v1285_v4 = vld [vmem:[%s1822_s1 + $0x1c] ss:$12 sps:$4 sm:$0xff]   ;;  %1189 = vmatpush3.bf16.msra.mxu1 %v1284_v3  ;;  %v1289_v7 = vld [vmem:[%s1822_s1 + $0x20] ss:$12 sps:$4 sm:$0xff]   ;;  %v1292_v9 = vld [vmem:[%s1822_s1 + $0xf8] ss:$12 sps:$4 sm:$0xff]  }
   0x4   :  { %696 = vmatprep.subr.bf16.mxu0 %v1285_v4  ;;  %1190 = vmatprep.subr.bf16.mxu1 %v1287_v5  ;;  %v1290_v8 = vld [vmem:[%s1822_s1 + $0x34] ss:$12 sps:$4 sm:$0xff]   ;;  %v1293_v10 = vld [vmem:[%s1822_s1 + $0x30] ss:$12 sps:$4 sm:$0xff]   ;;  %v1294_v11 = vld [vmem:[%s1822_s1 + $0x38] ss:$12 sps:$4 sm:$0xff]  }
   0x5   :  { %v1295_v12 = vld [vmem:[%s1822_s1 + $0x4c] ss:$12 sps:$4 sm:$0xff]   ;;  %v1297_v13 = vld [vmem:[%s1822_s1 + $0x110] ss:$12 sps:$4 sm:$0xff]   ;;  %v1298_v14 = vld [vmem:[%s1822_s1 + $0x48] ss:$12 sps:$4 sm:$0xff]  }
   0x6   :  { %v1299_v15 = vld [vmem:[%s1822_s1 + $0x50] ss:$12 sps:$4 sm:$0xff]   ;;  %v1302_v17 = vld [vmem:[%s1822_s1 + $0x128] ss:$12 sps:$4 sm:$0xff]   ;;  %v1303_v18 = vld [vmem:[%s1822_s1 + $0x60] ss:$12 sps:$4 sm:$0xff]  }
   0x7   :  { %697 = vmatpush1.bf16.msra.mxu0 %v1288_v6  ;;  %1191 = vmatpush3.bf16.msra.mxu1 %v1289_v7  ;;  %v1300_v16 = vld [vmem:[%s1822_s1 + $0x64] ss:$12 sps:$4 sm:$0xff]   ;;  %v1304_v19 = vld [vmem:[%s1822_s1 + $0x68] ss:$12 sps:$4 sm:$0xff]   ;;  %v1307_v21 = vld [vmem:[%s1822_s1 + $0x140] ss:$12 sps:$4 sm:$0xff]  }
   0x8   :  { %698 = vmatprep.subr.bf16.mxu0 %v1290_v8  ;;  %1192 = vmatprep.subr.bf16.mxu1 %v1292_v9  ;;  %v1305_v20 = vld [vmem:[%s1822_s1 + $0x7c] ss:$12 sps:$4 sm:$0xff]   ;;  %v1308_v22 = vld [vmem:[%s1822_s1 + $0x78] ss:$12 sps:$4 sm:$0xff]   ;;  %v1309_v23 = vld [vmem:[%s1822_s1 + $0x80] ss:$12 sps:$4 sm:$0xff]  }
   0x9   :  { %v1310_v24 = vld [vmem:[%s1822_s1 + $0x94] ss:$12 sps:$4 sm:$0xff]   ;;  %v1312_v25 = vld [vmem:[%s1822_s1 + $0x158] ss:$12 sps:$4 sm:$0xff]   ;;  %v1313_v26 = vld [vmem:[%s1822_s1 + $0x90] ss:$12 sps:$4 sm:$0xff]  }
   0xa   :  { %v1314_v27 = vld [vmem:[%s1822_s1 + $0x98] ss:$12 sps:$4 sm:$0xff]   ;;  %v1317_v29 = vld [vmem:[%s1822_s1 + $0x170] ss:$12 sps:$4 sm:$0xff]   ;;  %v1318_v31 = vld [vmem:[%s1822_s1 + $0xa8] ss:$12 sps:$4 sm:$0xff]  }
   0xb   :  { %699 = vmatpush1.bf16.msra.mxu0 %v1293_v10  ;;  %1193 = vmatpush3.bf16.msra.mxu1 %v1294_v11  ;;  %v1315_v28 = vld [vmem:[%s1822_s1 + $0xac] ss:$12 sps:$4 sm:$0xff]   ;;  %v21_v30 = vld [vmem:[%s1823_s0] sm:$0xff]  ;;  %v1319_v33 = vld [vmem:[%s1822_s1 + $0xb0] ss:$12 sps:$4 sm:$0xff]  }
   0xc   :  { %700 = vmatprep.subr.bf16.mxu0 %v1295_v12  ;;  %1194 = vmatprep.subr.bf16.mxu1 %v1297_v13  ;;  %v1075_v32 = vcombine.high %v21_v30, %v21_v30  ;;  %v1320_v34 = vld [vmem:[%s1822_s1 + $0xc4] ss:$12 sps:$4 sm:$0xff]   ;;  %v1325_v35 = vld [vmem:[%s1822_s1 + $0x248] ss:$12 sps:$4 sm:$0xff]   ;;  %v1566_v37 = vcombine.low %v21_v30, %v21_v30  ;;  %v1326_v38 = vld [vmem:[%s1822_s1 + $0xc0] ss:$12 sps:$4 sm:$0xff]  }
   0xd   :  { %v1564_v36 = vld [vmem:[%s1823_s0 + $0x8] sm:$0xff]  ;;  %v1331_v43 = vld [vmem:[%s1822_s1 + $0xd8] ss:$12 sps:$4 sm:$0xff]   ;;  %v1333_v45 = vld [vmem:[%s1822_s1 + $0xf4] ss:$12 sps:$4 sm:$0xff]  }
   0xe   :  { %808 = vmatprep.mubr.bf16.mxu1 %v1075_v32  ;;  %726 = vmatprep.mubr.bf16.mxu0 %v1075_v32  ;;  %v1327_v39 = vld [vmem:[%s1822_s1 + $0x188] ss:$12 sps:$4 sm:$0xff]   ;;  %v1330_v41 = vld [vmem:[%s1822_s1 + $0x260] ss:$12 sps:$4 sm:$0xff]   ;;  %v1582_v42 = vcombine.high %v1564_v36, %v1564_v36  ;;  %v1335_v46 = vld [vmem:[%s1822_s1 + $0x278] ss:$12 sps:$4 sm:$0xff]   ;;  %v1672_v7 = vcombine.low %v1564_v36, %v1564_v36 }
   0xf   :  { %701 = vmatpush1.bf16.msra.mxu0 %v1298_v14  ;;  %1195 = vmatpush3.bf16.msra.mxu1 %v1299_v15  ;;  %v1328_v40 = vld [vmem:[%s1822_s1 + $0xdc] ss:$12 sps:$4 sm:$0xff]   ;;  %v1332_v44 = vld [vmem:[%s1822_s1 + $0x1a0] ss:$12 sps:$4 sm:$0xff]   ;;  %v1337_v48 = vld [vmem:[%s1822_s1 + $0x1b8] ss:$12 sps:$4 sm:$0xff]  }
  0x10   :  { %702 = vmatprep.subr.bf16.mxu0 %v1300_v16  ;;  %1196 = vmatprep.subr.bf16.mxu1 %v1302_v17  ;;  %v1336_v47 = vld [vmem:[%s1822_s1 + $0xf0] ss:$12 sps:$4 sm:$0xff]   ;;  %v1338_v49 = vld [vmem:[%s1822_s1 + $0x10c] ss:$12 sps:$4 sm:$0xff]   ;;  %v1341_v51 = vld [vmem:[%s1822_s1 + $0x108] ss:$12 sps:$4 sm:$0xff]  }
  0x11   :  { %v1340_v50 = vld [vmem:[%s1822_s1 + $0x290] ss:$12 sps:$4 sm:$0xff]   ;;  %v1345_v54 = vld [vmem:[%s1822_s1 + $0x2a8] ss:$12 sps:$4 sm:$0xff]   ;;  %v1346_v55 = vld [vmem:[%s1822_s1 + $0x120] ss:$12 sps:$4 sm:$0xff]  }
  0x12   :  { %v1342_v52 = vld [vmem:[%s1822_s1 + $0x1d0] ss:$12 sps:$4 sm:$0xff]   ;;  %v1347_v56 = vld [vmem:[%s1822_s1 + $0x1e8] ss:$12 sps:$4 sm:$0xff]   ;;  %v1350_v58 = vld [vmem:[%s1822_s1 + $0x2c0] ss:$12 sps:$4 sm:$0xff]  }
  0x13   :  { %703 = vmatpush1.bf16.msra.mxu0 %v1303_v18  ;;  %1197 = vmatpush3.bf16.msra.mxu1 %v1304_v19  ;;  %v1343_v53 = vld [vmem:[%s1822_s1 + $0x124] ss:$12 sps:$4 sm:$0xff]   ;;  %v1348_v57 = vld [vmem:[%s1822_s1 + $0x13c] ss:$12 sps:$4 sm:$0xff]   ;;  %v1352_v60 = vld [vmem:[%s1822_s1 + $0x200] ss:$12 sps:$4 sm:$0xff]  }
  0x14   :  { %704 = vmatprep.subr.bf16.mxu0 %v1305_v20  ;;  %1198 = vmatprep.subr.bf16.mxu1 %v1307_v21  ;;  %v1351_v59 = vld [vmem:[%s1822_s1 + $0x138] ss:$12 sps:$4 sm:$0xff]   ;;  %v1353_v61 = vld [vmem:[%s1822_s1 + $0x154] ss:$12 sps:$4 sm:$0xff]   ;;  %v1356_v63 = vld [vmem:[%s1822_s1 + $0x150] ss:$12 sps:$4 sm:$0xff]  }
  0x15   :  { %v1355_v62 = vld [vmem:[%s1822_s1 + $0x2d8] ss:$12 sps:$4 sm:$0xff]   ;;  %v1360_v2 = vld [vmem:[%s1822_s1 + $0x2f0] ss:$12 sps:$4 sm:$0xff]   ;;  %v1361_v3 = vld [vmem:[%s1822_s1 + $0x168] ss:$12 sps:$4 sm:$0xff]  }
  0x16   :  { %v1357_v0 = vld [vmem:[%s1822_s1 + $0x218] ss:$12 sps:$4 sm:$0xff]   ;;  %v1362_v4 = vld [vmem:[%s1822_s1 + $0x230] ss:$12 sps:$4 sm:$0xff]   ;;  %v1364_v8 = vld [vmem:[%s1822_s1 + $0x180] ss:$12 sps:$4 sm:$0xff]  }
  0x17   :  { %705 = vmatpush1.bf16.msra.mxu0 %v1308_v22  ;;  %1199 = vmatpush3.bf16.msra.mxu1 %v1309_v23  ;;  %v1358_v1 = vld [vmem:[%s1822_s1 + $0x16c] ss:$12 sps:$4 sm:$0xff]   ;;  %v1366_v5 = vld [vmem:[%s1822_s1 + $0x184] ss:$12 sps:$4 sm:$0xff]   ;;  %v1370_v9 = vld [vmem:[%s1822_s1 + $0x19c] ss:$12 sps:$4 sm:$0xff]  }
  0x18   :  { %706 = vmatprep.subr.bf16.mxu0 %v1310_v24  ;;  %1200 = vmatprep.subr.bf16.mxu1 %v1312_v25  ;;  %v1367_v6 = vld [vmem:[%s1824_s4] sm:$0xff]   ;;  %v1371_v10 = vld [vmem:[%s1824_s4 + $0x8] sm:$0xff]   ;;  %v1375_v13 = vld [vmem:[%s1824_s4 + $0x10] sm:$0xff]  }
  0x19   :  { %v1368_v11 = vld [vmem:[%s1822_s1 + $0x198] ss:$12 sps:$4 sm:$0xff]   ;;  %v1374_v12 = vld [vmem:[%s1822_s1 + $0x1b4] ss:$12 sps:$4 sm:$0xff]   ;;  %v1372_v14 = vld [vmem:[%s1822_s1 + $0x1b0] ss:$12 sps:$4 sm:$0xff]  }
  0x1a   :  { %v1378_v15 = vld [vmem:[%s1822_s1 + $0x1cc] ss:$12 sps:$4 sm:$0xff]   ;;  %v1396_v16 = vld [vmem:[%s1825_s3] sm:$0xff]   ;;  %v1376_v18 = vld [vmem:[%s1822_s1 + $0x1c8] ss:$12 sps:$4 sm:$0xff]  }
  0x1b   :  { %707 = vmatpush1.bf16.msra.mxu0 %v1313_v26  ;;  %1201 = vmatpush3.bf16.msra.mxu1 %v1314_v27  ;;  %v1379_v17 = vld [vmem:[%s1824_s4 + $0x18] sm:$0xff]   ;;  %v1382_v19 = vld [vmem:[%s1822_s1 + $0x1e4] ss:$12 sps:$4 sm:$0xff]   ;;  %v1380_v21 = vld [vmem:[%s1822_s1 + $0x1e0] ss:$12 sps:$4 sm:$0xff]  }
  0x1c   :  { %708 = vmatprep.subr.bf16.mxu0 %v1315_v28  ;;  %1202 = vmatprep.subr.bf16.mxu1 %v1317_v29  ;;  %v1383_v20 = vld [vmem:[%s1824_s4 + $0x20] sm:$0xff]   ;;  %v1386_v22 = vld [vmem:[%s1822_s1 + $0x1fc] ss:$12 sps:$4 sm:$0xff]   ;;  %v1391_v26 = vld [vmem:[%s1824_s4 + $0x30] sm:$0xff]  }
  0x1d   :  { %v1387_v23 = vld [vmem:[%s1824_s4 + $0x28] sm:$0xff]   ;;  %v1384_v24 = vld [vmem:[%s1822_s1 + $0x1f8] ss:$12 sps:$4 sm:$0xff]   ;;  %v1390_v25 = vld [vmem:[%s1822_s1 + $0x214] ss:$12 sps:$4 sm:$0xff]  }
  0x1e   :  { %v1388_v27 = vld [vmem:[%s1822_s1 + $0x210] ss:$12 sps:$4 sm:$0xff]   ;;  %v1394_v28 = vld [vmem:[%s1822_s1 + $0x22c] ss:$12 sps:$4 sm:$0xff]   ;;  %v1392_v30 = vld [vmem:[%s1822_s1 + $0x228] ss:$12 sps:$4 sm:$0xff]  }
  0x1f   :  { %709 = vmatpush1.bf16.msra.mxu0 %v1318_v31  ;;  %1203 = vmatpush3.bf16.msra.mxu1 %v1319_v33  ;;  %v1395_v29 = vld [vmem:[%s1824_s4 + $0x38] sm:$0xff]   ;;  %v1399_v31 = vld [vmem:[%s1822_s1 + $0x244] ss:$12 sps:$4 sm:$0xff]   ;;  %v1397_v32 = vld [vmem:[%s1822_s1 + $0x240] ss:$12 sps:$4 sm:$0xff]  }
  0x20   :  { %710 = vmatprep.subr.bf16.mxu0 %v1320_v34  ;;  %1210 = vmatprep.subr.bf16.mxu1 %v1325_v35  ;;  %v1400_v33 = vld [vmem:[%s1825_s3 + $0x8] sm:$0xff]   ;;  %v1404_v35 = vld [vmem:[%s1825_s3 + $0x10] sm:$0xff]   ;;  %v1401_v36 = vld [vmem:[%s1822_s1 + $0x258] ss:$12 sps:$4 sm:$0xff]  }
  0x21   :  { %v1403_v34 = vld [vmem:[%s1822_s1 + $0x25c] ss:$12 sps:$4 sm:$0xff]  }
  0x22   :  { %809 = vmatmul.mubr.bf16.vlgmr.msra.gmra.mrb[0].mxu1 %v1566_v37 }
  0x23   :  { %711 = vmatpush1.bf16.msra.mxu0 %v1326_v38  ;;  %1211 = vmatpush3.bf16.msra.mxu1 %v1327_v39  ;;  %v1405_v38 = vld [vmem:[%s1822_s1 + $0x270] ss:$12 sps:$4 sm:$0xff]  }
  0x24   :  { %712 = vmatprep.subr.bf16.mxu0 %v1328_v40  ;;  %1212 = vmatprep.subr.bf16.mxu1 %v1330_v41  ;;  %v1408_v39 = vld [vmem:[%s1825_s3 + $0x18] sm:$0xff]   ;;  %v1412_v41 = vld [vmem:[%s1825_s3 + $0x20] sm:$0xff]  }
  0x25   :  { %848 = vmatprep.mubr.bf16.mxu1 %v1582_v42  ;;  %v1411_v40 = vld [vmem:[%s1822_s1 + $0x28c] ss:$12 sps:$4 sm:$0xff]  }
  0x27   :  { %713 = vmatpush1.bf16.msra.mxu0 %v1331_v43  ;;  %1213 = vmatpush3.bf16.msra.mxu1 %v1332_v44  ;;  %v1415_v43 = vld [vmem:[%s1822_s1 + $0x2a4] ss:$12 sps:$4 sm:$0xff]   ;;  %v1413_v44 = vld [vmem:[%s1822_s1 + $0x2a0] ss:$12 sps:$4 sm:$0xff]  }
  0x28   :  { %714 = vmatprep.subr.bf16.mxu0 %v1333_v45  ;;  %1214 = vmatprep.subr.bf16.mxu1 %v1335_v46  ;;  %v1416_v45 = vld [vmem:[%s1825_s3 + $0x28] sm:$0xff]  }
  0x29   :  { %v1419_v46 = vld [vmem:[%s1822_s1 + $0x2bc] ss:$12 sps:$4 sm:$0xff]  }
  0x2b   :  { %715 = vmatpush1.bf16.msra.mxu0 %v1336_v47  ;;  %1215 = vmatpush3.bf16.msra.mxu1 %v1337_v48  ;;  %v1417_v47 = vld [vmem:[%s1822_s1 + $0x2b8] ss:$12 sps:$4 sm:$0xff]   ;;  %v1422_v48 = vld [vmem:[%s1822_s1 + $0x2d4] ss:$12 sps:$4 sm:$0xff]  }
  0x2c   :  { %716 = vmatprep.subr.bf16.mxu0 %v1338_v49  ;;  %1216 = vmatprep.subr.bf16.mxu1 %v1340_v50  ;;  %v1420_v49 = vld [vmem:[%s1822_s1 + $0x2d0] ss:$12 sps:$4 sm:$0xff]   ;;  %v1425_v50 = vld [vmem:[%s1822_s1 + $0x2ec] ss:$12 sps:$4 sm:$0xff]  }
  0x2f   :  { %717 = vmatpush1.bf16.msra.mxu0 %v1341_v51  ;;  %1217 = vmatpush3.bf16.msra.mxu1 %v1342_v52  ;;  %v1423_v51 = vld [vmem:[%s1822_s1 + $0x2e8] ss:$12 sps:$4 sm:$0xff]  }
  0x30   :  { %718 = vmatprep.subr.bf16.mxu0 %v1343_v53  ;;  %1218 = vmatprep.subr.bf16.mxu1 %v1345_v54 }
  0x33   :  { %719 = vmatpush1.bf16.msra.mxu0 %v1346_v55  ;;  %1219 = vmatpush3.bf16.msra.mxu1 %v1347_v56 }
  0x34   :  { %720 = vmatprep.subr.bf16.mxu0 %v1348_v57  ;;  %1220 = vmatprep.subr.bf16.mxu1 %v1350_v58  ;;  %v153_v57 = vlaneseq }
  0x36   :  { %v154_v58 = vshrl.u32 %v153_v57, 7 }
  0x37   :  { %721 = vmatpush1.bf16.msra.mxu0 %v1351_v59  ;;  %1221 = vmatpush3.bf16.msra.mxu1 %v1352_v60  ;;  %v151_v60 = vld [vmem:[%s1826_s2] sm:$0x7] }
  0x38   :  { %722 = vmatprep.subr.bf16.mxu0 %v1353_v61  ;;  %1222 = vmatprep.subr.bf16.mxu1 %v1355_v62  ;;  %v163_v59 = vsub.s32 2, %v154_v58 }
  0x3a   :  { %v164_v61 = vrot.slane %v151_v60, %v163_v59 }
  0x3b   :  { %723 = vmatpush1.bf16.msra.mxu0 %v1356_v63  ;;  %1223 = vmatpush3.bf16.msra.mxu1 %v1357_v0 }
  0x3c   :  { %724 = vmatprep.subr.bf16.mxu0 %v1358_v1  ;;  %1224 = vmatprep.subr.bf16.mxu1 %v1360_v2 }
  0x3f   :  { %725 = vmatpush1.bf16.msra.mxu0 %v1361_v3  ;;  %1225 = vmatpush3.bf16.msra.mxu1 %v1362_v4 }
  0x40   :  { %735 = vmatprep.subr.bf16.mxu0 %v1366_v5  ;;  %1246 = vmatprep.subr.bf16.mxu1 %v1367_v6 }
  0x42   :  { %727 = vmatmul.mubr.bf16.vlgmr.msra.gmra.mrb[0].mxu0 %v1566_v37  ;;  %849 = vmatmul.mubr.bf16.vlgmr.msra.gmra.mrb[4].mxu1 %v1672_v7  ;;  %v1407_v37 = vld [vmem:[%s1822_s1 + $0x274] ss:$12 sps:$4 sm:$0xff]  }
  0x43   :  { %736 = vmatpush1.bf16.msra.mxu0 %v1364_v8  ;;  %1247 = vmatpush3.bf16.msra.mxu1 %v1367_v6 }
  0x44   :  { %737 = vmatprep.subr.bf16.mxu0 %v1370_v9  ;;  %1248 = vmatprep.subr.bf16.mxu1 %v1371_v10 }
  0x45   :  { %767 = vmatprep.mubr.bf16.mxu0 %v1582_v42  ;;  %1262 = vmatprep.mubr.bf16.mxu1 %v1396_v16  ;;  %v1409_v42 = vld [vmem:[%s1822_s1 + $0x288] ss:$12 sps:$4 sm:$0xff]  }
  0x47   :  { %738 = vmatpush1.bf16.msra.mxu0 %v1368_v11  ;;  %1249 = vmatpush3.bf16.msra.mxu1 %v1371_v10 }
  0x48   :  { %739 = vmatprep.subr.bf16.mxu0 %v1374_v12  ;;  %1250 = vmatprep.subr.bf16.mxu1 %v1375_v13 }
  0x4b   :  { %740 = vmatpush1.bf16.msra.mxu0 %v1372_v14  ;;  %1251 = vmatpush3.bf16.msra.mxu1 %v1375_v13 }
  0x4c   :  { %741 = vmatprep.subr.bf16.mxu0 %v1378_v15  ;;  %1252 = vmatprep.subr.bf16.mxu1 %v1379_v17 }
  0x4f   :  { %742 = vmatpush1.bf16.msra.mxu0 %v1376_v18  ;;  %1253 = vmatpush3.bf16.msra.mxu1 %v1379_v17 }
  0x50   :  { %743 = vmatprep.subr.bf16.mxu0 %v1382_v19  ;;  %1254 = vmatprep.subr.bf16.mxu1 %v1383_v20 }
  0x53   :  { %744 = vmatpush1.bf16.msra.mxu0 %v1380_v21  ;;  %1255 = vmatpush3.bf16.msra.mxu1 %v1383_v20  ;;  %v155_v20 = vsub.s32 0, %v154_v58  ;;  %v159_v21 = vsub.s32 1, %v154_v58 }
  0x54   :  { %745 = vmatprep.subr.bf16.mxu0 %v1386_v22  ;;  %1256 = vmatprep.subr.bf16.mxu1 %v1387_v23 }
  0x55   :  { %v156_v22 = vrot.slane %v151_v60, %v155_v20 }
  0x57   :  { %746 = vmatpush1.bf16.msra.mxu0 %v1384_v24  ;;  %1257 = vmatpush3.bf16.msra.mxu1 %v1387_v23  ;;  %v160_v23 = vrot.slane %v151_v60, %v159_v21 }
  0x58   :  { %747 = vmatprep.subr.bf16.mxu0 %v1390_v25  ;;  %1258 = vmatprep.subr.bf16.mxu1 %v1391_v26 }
  0x5b   :  { %748 = vmatpush1.bf16.msra.mxu0 %v1388_v27  ;;  %1259 = vmatpush3.bf16.msra.mxu1 %v1391_v26 }
  0x5c   :  { %749 = vmatprep.subr.bf16.mxu0 %v1394_v28  ;;  %1260 = vmatprep.subr.bf16.mxu1 %v1395_v29 }
  0x5f   :  { %750 = vmatpush1.bf16.msra.mxu0 %v1392_v30  ;;  %1261 = vmatpush3.bf16.msra.mxu1 %v1395_v29 }
  0x60   :  { %751 = vmatprep.subr.bf16.mxu0 %v1399_v31 }
  0x62   :  { %1263 = vmatmul.mubr.bf16.vlgmr.msra.gmra.mrb[8].mxu1 %v1400_v33 }
  0x63   :  { %752 = vmatpush1.bf16.msra.mxu0 %v1397_v32  ;;  %1266 = vmatprep.mubr.bf16.mxu1 %v1404_v35 }
  0x64   :  { %753 = vmatprep.subr.bf16.mxu0 %v1403_v34 }
  0x67   :  { %754 = vmatpush1.bf16.msra.mxu0 %v1401_v36 }
  0x68   :  { %755 = vmatprep.subr.bf16.mxu0 %v1407_v37 }
  0x6a   :  { %1267 = vmatmul.mubr.bf16.gmra.mrb[12].mxu1 %v1408_v39 }
  0x6b   :  { %756 = vmatpush1.bf16.msra.mxu0 %v1405_v38  ;;  %1270 = vmatprep.mubr.bf16.mxu1 %v1412_v41 }
  0x6c   :  { %757 = vmatprep.subr.bf16.mxu0 %v1411_v40 }
  0x6f   :  { %758 = vmatpush1.bf16.msra.mxu0 %v1409_v42 }
  0x70   :  { %759 = vmatprep.subr.bf16.mxu0 %v1415_v43 }
  0x72   :  { %1271 = vmatmul.mubr.bf16.gmra.mrb[16].mxu1 %v1416_v45 }
  0x73   :  { %760 = vmatpush1.bf16.msra.mxu0 %v1413_v44 }
  0x74   :  { %761 = vmatprep.subr.bf16.mxu0 %v1419_v46 }
  0x77   :  { %762 = vmatpush1.bf16.msra.mxu0 %v1417_v47 }
  0x78   :  { %763 = vmatprep.subr.bf16.mxu0 %v1422_v48 }
  0x7b   :  { %764 = vmatpush1.bf16.msra.mxu0 %v1420_v49 }
  0x7c   :  { %765 = vmatprep.subr.bf16.mxu0 %v1425_v50 }
  0x7f   :  { %766 = vmatpush1.bf16.msra.mxu0 %v1423_v51 }
  0x82   :  { %768 = vmatmul.mubr.bf16.vlgmr.msra.gmra.mrb[0].mxu0 %v1672_v7 }
  0xf5   :  { %v1204_v52 = vpop.f32.mrb[0].mxu1 }
  0xf6   :  { %v1205_v53 = vpop.f32.mrb[1].mxu1 }
  0xf7   :  { %v1206_v54 = vadd.f32 %v1205_v53, %v1204_v52  ;;  %v1207_v55 = vpop.f32.mrb[2].mxu1 }
  0xf8   :  { %v1208_v56 = vpop.f32.mrb[3].mxu1 }
  0xf9   :  { %v811_v0 = vadd.f32 %v1206_v54, %v164_v61 }
 0x115   :  { %v1226_v62 = vpop.f32.mrb[4].mxu1 }
 0x116   :  { %v1227_v63 = vpop.f32.mrb[5].mxu1 }
 0x117   :  { %v1228_v1 = vadd.f32 %v1227_v63, %v1226_v62  ;;  %v1229_v2 = vpop.f32.mrb[6].mxu1 }
 0x118   :  { %v1230_v3 = vpop.f32.mrb[7].mxu1 }
 0x119   :  { %v851_v4 = vadd.f32 %v1228_v1, %v811_v0 }
 0x135   :  { %v1264_v5 = vpop.f32.mrb[8].mxu1 }
 0x136   :  { %v1052_v6 = vmul.f32 %v1264_v5, %v851_v4  ;;  %v1002_v7 = vpop.f32.mrb[9].mxu1 }
 0x137   :  { %v1265_v8 = vpop.f32.mrb[10].mxu1 }
 0x138   :  { %v1005_v9 = vpop.f32.mrb[11].mxu1 }
 0x13d   :  { %v1268_v10 = vpop.f32.mrb[12].mxu1 }
 0x13e   :  { %v1059_v11 = vmul.f32 %v1268_v10, %v851_v4  ;;  %v1018_v12 = vpop.f32.mrb[13].mxu1 }
 0x13f   :  { %v1269_v13 = vpop.f32.mrb[14].mxu1 }
 0x140   :  { %v1021_v14 = vpop.f32.mrb[15].mxu1 }
 0x145   :  { %v1272_v15 = vpop.f32.mrb[16].mxu1 }
 0x146   :  { %v1066_v16 = vmul.f32 %v1272_v15, %v851_v4  ;;  %v1034_v17 = vpop.f32.mrb[17].mxu1 }
 0x147   :  { %v1273_v18 = vpop.f32.mrb[18].mxu1 }
 0x148   :  { %v1037_v19 = vpop.f32.mrb[19].mxu1 }
 0x155   :  { %v769_v24 = vpop.f32.mrb[0].mxu0 }
 0x156   :  { %v1274_v25 = vadd.f32 %v769_v24, %v156_v22  ;;  %v771_v26 = vpop.f32.mrb[1].mxu0 }
 0x157   :  { %v1275_v27 = vadd.f32 %v771_v26, %v160_v23  ;;  %v773_v28 = vpop.f32.mrb[2].mxu0 }
 0x158   :  { %v1049_v29 = vmul.f32 %v1274_v25, %v1002_v7  ;;  %v1056_v30 = vmul.f32 %v1274_v25, %v1018_v12  ;;  %v1063_v31 = vmul.f32 %v1274_v25, %v1034_v17  ;;  %v774_v32 = vpop.f32.mrb[3].mxu0 }
 0x159   :  { %v1050_v33 = vmul.f32 %v1275_v27, %v1005_v9  ;;  %v1057_v34 = vmul.f32 %v1275_v27, %v1021_v14  ;;  %v1064_v35 = vmul.f32 %v1275_v27, %v1037_v19 }
 0x15b   :  { %v1051_v36 = vadd.f32 %v1050_v33, %v1049_v29  ;;  %v1058_v37 = vadd.f32 %v1057_v34, %v1056_v30  ;;  %v1065_v38 = vadd.f32 %v1064_v35, %v1063_v31 }
 0x15d   :  { %v1053_v39 = vadd.f32 %v1052_v6, %v1051_v36  ;;  %v1060_v40 = vadd.f32 %v1059_v11, %v1058_v37  ;;  %v1067_v41 = vadd.f32 %v1066_v16, %v1065_v38 }
 0x15f   :  { %v1054_v42 = vadd.f32 %v1265_v8, %v1053_v39  ;;  %v1061_v43 = vadd.f32 %v1269_v13, %v1060_v40  ;;  %v1068_v44 = vadd.f32 %v1273_v18, %v1067_v41 }
 0x161   :  { %1055 = vst [vmem:[%s1827_s5] sm:$0xff] %v1054_v42  ;;  %1062 = vst [vmem:[%s1827_s5 + $0x8] sm:$0xff] %v1061_v43 }
 0x162   :  { %1069 = vst [vmem:[%s1827_s5 + $0x10] sm:$0xff] %v1068_v44 }

</bundles_post_ra>
